<compile_context>
chip_gen: v5e
topology: v5e:2x2
jax: 0.10.0
libtpu: 0.0.40
codegen_flags: <defaults>
</compile_context>

<pallas_src>
import functools

import jax
import jax.numpy as jnp
from jax.experimental import pallas as pl
from jax.experimental.pallas import tpu as pltpu


# ------------------------------ kernel bodies ------------------------------ #

def _mlp_kernel_with_h(x_ref, w1_ref, b1_ref, w2_ref, b2_ref, w3_ref, b3_ref,
                       h_ref, out_ref):
    # Layer 1: Linear + ReLU (MXU matmul, f32 accumulation, f32 elementwise).
    h1 = jnp.dot(x_ref[...], w1_ref[...], preferred_element_type=jnp.float32)
    h1 = jnp.maximum(h1 + b1_ref[...], 0.0)
    # Layer 2: Linear + ReLU (this is the "x_h" hidden representation).
    h2 = jnp.dot(h1.astype(w2_ref.dtype), w2_ref[...],
                 preferred_element_type=jnp.float32)
    h2 = jnp.maximum(h2 + b2_ref[...], 0.0)
    h_ref[...] = h2.astype(h_ref.dtype)
    # Layer 3: Linear (logits).
    out = jnp.dot(h2.astype(w3_ref.dtype), w3_ref[...],
                  preferred_element_type=jnp.float32)
    out_ref[...] = (out + b3_ref[...]).astype(out_ref.dtype)


def _mlp_kernel_out_only(x_ref, w1_ref, b1_ref, w2_ref, b2_ref, w3_ref, b3_ref,
                         out_ref):
    h1 = jnp.dot(x_ref[...], w1_ref[...], preferred_element_type=jnp.float32)
    h1 = jnp.maximum(h1 + b1_ref[...], 0.0)
    h2 = jnp.dot(h1.astype(w2_ref.dtype), w2_ref[...],
                 preferred_element_type=jnp.float32)
    h2 = jnp.maximum(h2 + b2_ref[...], 0.0)
    out = jnp.dot(h2.astype(w3_ref.dtype), w3_ref[...],
                  preferred_element_type=jnp.float32)
    out_ref[...] = (out + b3_ref[...]).astype(out_ref.dtype)


# ------------------------------ helpers ------------------------------------ #

def _round_up(x, m):
    return ((x + m - 1) // m) * m


def _pad2(a, rows, cols):
    r, c = a.shape
    if r == rows and c == cols:
        return a
    return jnp.pad(a, ((0, rows - r), (0, cols - c)))


def _physical_vmem_bytes():
    try:
        return int(pltpu.get_tpu_info().vmem_capacity_bytes)
    except Exception:
        return 64 << 20  # conservative default (v7x per-TC VMEM)


@functools.lru_cache(maxsize=1)
def _buffered_single_supported():
    """True iff this JAX/Mosaic accepts pipeline_mode=pl.Buffered(1) on a BlockSpec.

    Single-buffering the constant-index_map (resident) weights halves their VMEM
    footprint; probe once so older JAX versions fall back to default buffering
    instead of failing to compile.
    """
    try:
        def _probe_kernel(x_ref, o_ref):
            o_ref[...] = x_ref[...] + 1.0

        probe = pl.pallas_call(
            _probe_kernel,
            grid=(2,),
            in_specs=[pl.BlockSpec((8, 128), lambda i: (0, 0),
                                   pipeline_mode=pl.Buffered(1))],
            out_specs=pl.BlockSpec((8, 128), lambda i: (i, 0)),
            out_shape=jax.ShapeDtypeStruct((16, 128), jnp.float32),
        )
        jax.block_until_ready(probe(jnp.zeros((8, 128), jnp.float32)))
        return True
    except Exception:
        return False


def _vmem_limit_bytes(tm, in_p, h_p, c_p, *, x_bytes, w_bytes, h_bytes,
                      with_h, single_buf_w):
    """VMEM budget: streamed activations (double-buffered), resident weights/biases
    (single- or double-buffered), in-kernel f32 intermediates, plus headroom; clamped
    to ~85% of physical VMEM (generation-aware)."""
    wbuf = 1 if single_buf_w else 2
    act_in = tm * in_p * x_bytes * 2                                 # x tile
    act_out = tm * c_p * 4 * 2 + (tm * h_p * h_bytes * 2 if with_h else 0)
    weights = (in_p * h_p + h_p * h_p + h_p * c_p) * w_bytes * wbuf
    biases = (2 * h_p + c_p) * 4 * wbuf
    interm = 2 * tm * h_p * 4 + tm * c_p * 4                         # f32 h1/h2/logits
    need = act_in + act_out + weights + biases + interm + (8 << 20)  # headroom
    ceiling = int(_physical_vmem_bytes() * 0.85)  # ~56 MiB v7x, ~108 MiB v5e/v6e
    return int(min(max(need, 32 << 20), ceiling))


# ------------------------------ wrapper ------------------------------------ #

def prepare_params(params, mxu_dtype=jnp.bfloat16):
    """Pad feature dims to multiples of 128 and cast MXU operands ONCE.

    Call this once per parameter set and reuse the result across forward calls
    (avoids re-reading / re-writing every weight in HBM on every call).
    Zero-padding is semantics-preserving: padded x columns hit zero weight rows,
    padded hidden/output columns get zero weights and zero biases.
    """
    in_dim, h_dim = params["w1"].shape
    num_classes = params["w3"].shape[1]
    in_p, h_p, c_p = (_round_up(d, 128) for d in (in_dim, h_dim, num_classes))
    prepared = {
        "w1": _pad2(params["w1"], in_p, h_p).astype(mxu_dtype),
        "w2": _pad2(params["w2"], h_p, h_p).astype(mxu_dtype),
        "w3": _pad2(params["w3"], h_p, c_p).astype(mxu_dtype),
        "b1": _pad2(params["b1"], 1, h_p).astype(jnp.float32),
        "b2": _pad2(params["b2"], 1, h_p).astype(jnp.float32),
        "b3": _pad2(params["b3"], 1, c_p).astype(jnp.float32),
    }
    return prepared, (in_dim, h_dim, num_classes)


@functools.partial(
    jax.jit,
    static_argnames=("dims", "return_h", "tm", "single_buffer_weights"))
def _forward(x, prepared, dims, return_h, tm, single_buffer_weights):
    in_dim, h_dim, num_classes = dims
    B = x.shape[0]
    w1, w2, w3 = prepared["w1"], prepared["w2"], prepared["w3"]
    b1, b2, b3 = prepared["b1"], prepared["b2"], prepared["b3"]
    in_p, h_p = w1.shape
    c_p = w3.shape[1]
    mxu_dtype = w1.dtype
    h_dtype = mxu_dtype  # hidden writeback in MXU dtype (halves HBM stores for bf16)

    # Batch tile: multiple of 8, as large as `tm` allows; batch dim is NOT padded —
    # the partial last block's out-of-range rows are computed but never stored.
    tm_eff = max(8, min(_round_up(tm, 8), _round_up(B, 8)))
    grid = (pl.cdiv(B, tm_eff),)

    # Only the feature dim of x is zero-padded to a lane-dense width.
    x_p = x.astype(mxu_dtype)
    if in_p != in_dim:
        x_p = jnp.pad(x_p, ((0, 0), (0, in_p - in_dim)))

    # TODO(synk): add a hidden-dim (K/N) tiled fallback for h_dim large enough that the
    # three resident weight matrices exceed the per-generation VMEM budget (v7x 64 MiB).
    vmem_limit = _vmem_limit_bytes(
        tm_eff, in_p, h_p, c_p,
        x_bytes=jnp.dtype(mxu_dtype).itemsize,
        w_bytes=jnp.dtype(mxu_dtype).itemsize,
        h_bytes=jnp.dtype(h_dtype).itemsize,
        with_h=return_h,
        single_buf_w=single_buffer_weights,
    )

    def resident(shape):
        # Weights/biases: constant index_map (VMEM-resident across the grid);
        # single-buffered when supported to halve their VMEM footprint.
        if single_buffer_weights:
            return pl.BlockSpec(shape, lambda i: (0, 0), pipeline_mode=pl.Buffered(1))
        return pl.BlockSpec(shape, lambda i: (0, 0))

    in_specs = [
        pl.BlockSpec((tm_eff, in_p), lambda i: (i, 0)),   # x tile (streams)
        resident((in_p, h_p)), resident((1, h_p)),        # w1, b1
        resident((h_p, h_p)),  resident((1, h_p)),        # w2, b2
        resident((h_p, c_p)),  resident((1, c_p)),        # w3, b3
    ]
    compiler_params = pltpu.CompilerParams(
        dimension_semantics=("parallel",),
        vmem_limit_bytes=vmem_limit,
    )
    args = (x_p, w1, b1, w2, b2, w3, b3)

    if return_h:
        h_full, out_full = pl.pallas_call(
            _mlp_kernel_with_h,
            grid=grid,
            out_shape=(
                jax.ShapeDtypeStruct((B, h_p), h_dtype),
                jax.ShapeDtypeStruct((B, c_p), jnp.float32),
            ),
            in_specs=in_specs,
            out_specs=(
                pl.BlockSpec((tm_eff, h_p), lambda i: (i, 0)),
                pl.BlockSpec((tm_eff, c_p), lambda i: (i, 0)),
            ),
            compiler_params=compiler_params,
        )(*args)
        return h_full[:, :h_dim], out_full[:, :num_classes]

    out_full = pl.pallas_call(
        _mlp_kernel_out_only,
        grid=grid,
        out_shape=jax.ShapeDtypeStruct((B, c_p), jnp.float32),
        in_specs=in_specs,
        out_specs=pl.BlockSpec((tm_eff, c_p), lambda i: (i, 0)),
        compiler_params=compiler_params,
    )(*args)
    return out_full[:, :num_classes]


def three_layer_net_prepared(x, prepared, dims, return_h=False, tm=512):
    """Fast path: use with params already padded/cast by prepare_params()."""
    return _forward(x, prepared, dims=dims, return_h=return_h, tm=tm,
                    single_buffer_weights=_buffered_single_supported())


def three_layer_net(x, params, return_h=False, tm=512, mxu_dtype=jnp.bfloat16):
    """Convenience wrapper (re-pads/casts params every call).

    For repeated inference, call prepare_params() once and use
    three_layer_net_prepared() so weights are not re-padded/re-cast in HBM per call.
    Default mxu_dtype=bfloat16 (f32 accumulation); pass jnp.float32 for ~1e-5 accuracy.
    """
    prepared, dims = prepare_params(params, mxu_dtype)
    return three_layer_net_prepared(x, prepared, dims, return_h=return_h, tm=tm)


# ------------------------------ init / reference --------------------------- #

def init_params(key, in_dim, h_dim, num_classes):
    """Xavier-normal weights (matching nn.init.xavier_normal_), zero biases."""
    k1, k2, k3 = jax.random.split(key, 3)

    def xavier_normal(k, fan_in, fan_out):
        std = jnp.sqrt(2.0 / (fan_in + fan_out))
        # stored as [in, out] so the kernel computes x @ W
        return (std * jax.random.normal(k, (fan_in, fan_out))).astype(jnp.float32)

    return {
        "w1": xavier_normal(k1, in_dim, h_dim),
        "b1": jnp.zeros((1, h_dim), jnp.float32),
        "w2": xavier_normal(k2, h_dim, h_dim),
        "b2": jnp.zeros((1, h_dim), jnp.float32),
        "w3": xavier_normal(k3, h_dim, num_classes),
        "b3": jnp.zeros((1, num_classes), jnp.float32),
    }


def _reference(x, p):
    h1 = jnp.maximum(x @ p["w1"] + p["b1"], 0.0)
    h2 = jnp.maximum(h1 @ p["w2"] + p["b2"], 0.0)
    return h2, h2 @ p["w3"] + p["b3"]


if __name__ == "__main__":
    B, in_dim, h_dim, num_classes = 10, 32, 32, 8   # non-multiple-of-8 batch on purpose
    key = jax.random.PRNGKey(0)
    kx, kp = jax.random.split(key)
    x = jax.random.normal(kx, (B, in_dim), dtype=jnp.float32)
    params = init_params(kp, in_dim, h_dim, num_classes)
    ref_h, ref_out = _reference(x, params)

    # ---- default bf16 MXU-operand path: prepare padded params once, reuse ----
    prepared, dims = prepare_params(params)                       # bf16 by default
    out = three_layer_net_prepared(x, prepared, dims, return_h=False)
    x_h, out2 = three_layer_net_prepared(x, prepared, dims, return_h=True)
    jax.block_until_ready((out, x_h, out2))

    assert out.shape == (B, num_classes) and x_h.shape == (B, h_dim)
    assert jnp.allclose(out, ref_out, atol=5e-2, rtol=5e-2)
    assert jnp.allclose(out2, ref_out, atol=5e-2, rtol=5e-2)
    assert jnp.allclose(x_h.astype(jnp.float32), ref_h, atol=5e-2, rtol=5e-2)

    # ---- f32 path (strict tolerance) ----
    out_f32 = three_layer_net(x, params, return_h=False, mxu_dtype=jnp.float32)
    h_f32, out_f32b = three_layer_net(x, params, return_h=True, mxu_dtype=jnp.float32)
    jax.block_until_ready((out_f32, h_f32, out_f32b))
    assert jnp.allclose(out_f32, ref_out, atol=1e-5, rtol=1e-5)
    assert jnp.allclose(out_f32b, ref_out, atol=1e-5, rtol=1e-5)
    assert jnp.allclose(h_f32, ref_h, atol=1e-5, rtol=1e-5)

    print("KERNEL_OK")
</pallas_src>

<mosaic_0001>
module attributes {stable_mosaic.version = 11 : i64} {
  func.func @_probe_kernel(%arg0: i32, %arg1: memref<8x128xf32, #tpu.memory_space<vmem>>, %arg2: memref<8x128xf32, #tpu.memory_space<vmem>>) attributes {dimension_semantics = [#tpu.dimension_semantics<arbitrary>], iteration_bounds = array<i64: 2>, scalar_prefetch = 0 : i64, scratch_operands = 0 : i64, tpu.core_type = #tpu.core_type<tc>, window_params = [{pipeline_mode = #tpu.pipeline_mode<synchronous>, transform_indices = @transform_0, window_bounds = array<i64: 8, 128>}, {transform_indices = @transform_1, window_bounds = array<i64: 8, 128>}]} {
    %c0 = arith.constant 0 : index
    %c0_0 = arith.constant 0 : index
    %0 = vector.load %arg1[%c0, %c0_0] : memref<8x128xf32, #tpu.memory_space<vmem>>, vector<8x128xf32>
    %cst = arith.constant 1.000000e+00 : f32
    %1 = vector.broadcast %cst : f32 to vector<8x128xf32>
    %2 = arith.addf %0, %1 : vector<8x128xf32>
    %c0_1 = arith.constant 0 : index
    %c0_2 = arith.constant 0 : index
    %3 = vector.load %arg2[%c0_1, %c0_2] : memref<8x128xf32, #tpu.memory_space<vmem>>, vector<8x128xf32>
    tpu.vector_store %arg2[%c0_1, %c0_2], %2 {strides = array<i32>} : memref<8x128xf32, #tpu.memory_space<vmem>>, vector<8x128xf32>,
    return
  }
  func.func @transform_0(%arg0: i32) -> (i32, i32) {
    %c0_i32 = arith.constant 0 : i32
    %c0_i32_0 = arith.constant 0 : i32
    %c0_i32_1 = arith.constant 0 : i32
    return %c0_i32, %c0_i32_0 : i32, i32
  }
  func.func @transform_1(%arg0: i32) -> (i32, i32) {
    %c0_i32 = arith.constant 0 : i32
    %c0_i32_0 = arith.constant 0 : i32
    return %arg0, %c0_i32 : i32, i32
  }
}

module attributes {stable_mosaic.version = 11 : i64} {
  func.func @_mlp_kernel_out_only(%arg0: i32, %arg1: memref<16x128xbf16, #tpu.memory_space<vmem>>, %arg2: memref<128x128xbf16, #tpu.memory_space<vmem>>, %arg3: memref<1x128xf32, #tpu.memory_space<vmem>>, %arg4: memref<128x128xbf16, #tpu.memory_space<vmem>>, %arg5: memref<1x128xf32, #tpu.memory_space<vmem>>, %arg6: memref<128x128xbf16, #tpu.memory_space<vmem>>, %arg7: memref<1x128xf32, #tpu.memory_space<vmem>>, %arg8: memref<16x128xf32, #tpu.memory_space<vmem>>) attributes {dimension_semantics = [#tpu.dimension_semantics<parallel>], iteration_bounds = array<i64: 1>, scalar_prefetch = 0 : i64, scratch_operands = 0 : i64, tpu.core_type = #tpu.core_type<tc>, window_params = [{transform_indices = @transform_0, window_bounds = array<i64: 16, 128>}, {pipeline_mode = #tpu.pipeline_mode<synchronous>, transform_indices = @transform_1, window_bounds = array<i64: 128, 128>}, {pipeline_mode = #tpu.pipeline_mode<synchronous>, transform_indices = @transform_2, window_bounds = array<i64: 1, 128>}, {pipeline_mode = #tpu.pipeline_mode<synchronous>, transform_indices = @transform_3, window_bounds = array<i64: 128, 128>}, {pipeline_mode = #tpu.pipeline_mode<synchronous>, transform_indices = @transform_4, window_bounds = array<i64: 1, 128>}, {pipeline_mode = #tpu.pipeline_mode<synchronous>, transform_indices = @transform_5, window_bounds = array<i64: 128, 128>}, {pipeline_mode = #tpu.pipeline_mode<synchronous>, transform_indices = @transform_6, window_bounds = array<i64: 1, 128>}, {transform_indices = @transform_7, window_bounds = array<i64: 16, 128>}]} {
    %c0 = arith.constant 0 : index
    %c0_0 = arith.constant 0 : index
    %0 = vector.load %arg1[%c0, %c0_0] : memref<16x128xbf16, #tpu.memory_space<vmem>>, vector<16x128xbf16>
    %c0_1 = arith.constant 0 : index
    %c0_2 = arith.constant 0 : index
    %1 = vector.load %arg2[%c0_1, %c0_2] : memref<128x128xbf16, #tpu.memory_space<vmem>>, vector<128x128xbf16>
    %cst = arith.constant dense<0.000000e+00> : vector<16x128xf32>
    %2 = tpu.matmul %0, %1, %cst {dimension_numbers = #tpu.dot_dimension_numbers<[1], [0], [0], [1], [0, 0, 1, 1], [], []>} : vector<16x128xbf16>, vector<128x128xbf16>, vector<16x128xf32> -> vector<16x128xf32>
    %c0_3 = arith.constant 0 : index
    %c0_4 = arith.constant 0 : index
    %3 = vector.load %arg3[%c0_3, %c0_4] : memref<1x128xf32, #tpu.memory_space<vmem>>, vector<1x128xf32>
    %4 = vector.broadcast %3 : vector<1x128xf32> to vector<16x128xf32>
    %5 = arith.addf %2, %4 : vector<16x128xf32>
    %cst_5 = arith.constant 0.000000e+00 : f32
    %6 = vector.broadcast %cst_5 : f32 to vector<16x128xf32>
    %7 = arith.maximumf %5, %6 : vector<16x128xf32>
    %8 = arith.truncf %7 : vector<16x128xf32> to vector<16x128xbf16>
    %c0_6 = arith.constant 0 : index
    %c0_7 = arith.constant 0 : index
    %9 = vector.load %arg4[%c0_6, %c0_7] : memref<128x128xbf16, #tpu.memory_space<vmem>>, vector<128x128xbf16>
    %cst_8 = arith.constant dense<0.000000e+00> : vector<16x128xf32>
    %10 = tpu.matmul %8, %9, %cst_8 {dimension_numbers = #tpu.dot_dimension_numbers<[1], [0], [0], [1], [0, 0, 1, 1], [], []>} : vector<16x128xbf16>, vector<128x128xbf16>, vector<16x128xf32> -> vector<16x128xf32>
    %c0_9 = arith.constant 0 : index
    %c0_10 = arith.constant 0 : index
    %11 = vector.load %arg5[%c0_9, %c0_10] : memref<1x128xf32, #tpu.memory_space<vmem>>, vector<1x128xf32>
    %12 = vector.broadcast %11 : vector<1x128xf32> to vector<16x128xf32>
    %13 = arith.addf %10, %12 : vector<16x128xf32>
    %cst_11 = arith.constant 0.000000e+00 : f32
    %14 = vector.broadcast %cst_11 : f32 to vector<16x128xf32>
    %15 = arith.maximumf %13, %14 : vector<16x128xf32>
    %16 = arith.truncf %15 : vector<16x128xf32> to vector<16x128xbf16>
    %c0_12 = arith.constant 0 : index
    %c0_13 = arith.constant 0 : index
    %17 = vector.load %arg6[%c0_12, %c0_13] : memref<128x128xbf16, #tpu.memory_space<vmem>>, vector<128x128xbf16>
    %cst_14 = arith.constant dense<0.000000e+00> : vector<16x128xf32>
    %18 = tpu.matmul %16, %17, %cst_14 {dimension_numbers = #tpu.dot_dimension_numbers<[1], [0], [0], [1], [0, 0, 1, 1], [], []>} : vector<16x128xbf16>, vector<128x128xbf16>, vector<16x128xf32> -> vector<16x128xf32>
    %c0_15 = arith.constant 0 : index
    %c0_16 = arith.constant 0 : index
    %19 = vector.load %arg7[%c0_15, %c0_16] : memref<1x128xf32, #tpu.memory_space<vmem>>, vector<1x128xf32>
    %20 = vector.broadcast %19 : vector<1x128xf32> to vector<16x128xf32>
    %21 = arith.addf %18, %20 : vector<16x128xf32>
    %c0_17 = arith.constant 0 : index
    %c0_18 = arith.constant 0 : index
    %22 = vector.load %arg8[%c0_17, %c0_18] : memref<16x128xf32, #tpu.memory_space<vmem>>, vector<16x128xf32>
    tpu.vector_store %arg8[%c0_17, %c0_18], %21 {strides = array<i32>} : memref<16x128xf32, #tpu.memory_space<vmem>>, vector<16x128xf32>,
    return
  }
  func.func @transform_0(%arg0: i32) -> (i32, i32) {
    %c0_i32 = arith.constant 0 : i32
    %c0_i32_0 = arith.constant 0 : i32
    return %arg0, %c0_i32 : i32, i32
  }
  func.func @transform_1(%arg0: i32) -> (i32, i32) {
    %c0_i32 = arith.constant 0 : i32
    %c0_i32_0 = arith.constant 0 : i32
    %c0_i32_1 = arith.constant 0 : i32
    return %c0_i32, %c0_i32_0 : i32, i32
  }
  func.func @transform_2(%arg0: i32) -> (i32, i32) {
    %c0_i32 = arith.constant 0 : i32
    %c0_i32_0 = arith.constant 0 : i32
    %c0_i32_1 = arith.constant 0 : i32
    return %c0_i32, %c0_i32_0 : i32, i32
  }
  func.func @transform_3(%arg0: i32) -> (i32, i32) {
    %c0_i32 = arith.constant 0 : i32
    %c0_i32_0 = arith.constant 0 : i32
    %c0_i32_1 = arith.constant 0 : i32
    return %c0_i32, %c0_i32_0 : i32, i32
  }
  func.func @transform_4(%arg0: i32) -> (i32, i32) {
    %c0_i32 = arith.constant 0 : i32
    %c0_i32_0 = arith.constant 0 : i32
    %c0_i32_1 = arith.constant 0 : i32
    return %c0_i32, %c0_i32_0 : i32, i32
  }
  func.func @transform_5(%arg0: i32) -> (i32, i32) {
    %c0_i32 = arith.constant 0 : i32
    %c0_i32_0 = arith.constant 0 : i32
    %c0_i32_1 = arith.constant 0 : i32
    return %c0_i32, %c0_i32_0 : i32, i32
  }
  func.func @transform_6(%arg0: i32) -> (i32, i32) {
    %c0_i32 = arith.constant 0 : i32
    %c0_i32_0 = arith.constant 0 : i32
    %c0_i32_1 = arith.constant 0 : i32
    return %c0_i32, %c0_i32_0 : i32, i32
  }
  func.func @transform_7(%arg0: i32) -> (i32, i32) {
    %c0_i32 = arith.constant 0 : i32
    %c0_i32_0 = arith.constant 0 : i32
    return %arg0, %c0_i32 : i32, i32
  }
}

</mosaic_0001>

<bundles_post_ra>
// kernel: tpu_custom_call.1
= control target key start
LH: loop header
LB: loop body
LE: loop exit
PB: predicated region body
PF: predicated region fallthrough
CT: control target
= control target key end

     0   :  { %6 = vsyncpa [#allocation3], 0  ;;  %s441_s0 = inlined_call_operand.hbm [shape: f32[8,128], index: 0, kind: input, shape index: {}]   ;;  %s442_s1 = inlined_call_operand.hbm [shape: f32[16,128], index: 1, kind: output, shape index: {}]  }
   0x1   :  { %7 = vsyncpa [#allocation4], 0 }
   0x2   :  { %9 = vsyncpa [#allocation4 + $0x1], 0  ;;  %s357_s6 = smov 0   ;;  %s359_s7 = smov 0  }
   0x3   :  { %s361_s8 = smov 0   ;;  %s363_s9 = smov 0  }
   0x4 LB: > { %s378_s10 = sadd.s32 4294967295, %s344_s9   ;;  %s188_s11 = sadd.s32 4294967294, %s344_s9   ;;  %s344_s9 = sphi %s363_s9, %s448_s9   ;;  %s340_s8 = sphi %s361_s8, %s447_s8   ;;  %s336_s7 = sphi %s359_s7, %s446_s7   ;;  %s332_s6 = sphi %s357_s6, %s445_s6  }
   0x5   : > { %s382_s12 = sadd.s32 1, %s344_s9   ;;  %s43_s13 = sadd.s32 1, %s340_s8 }
   0x6   : > { %s40_s14 = ssub.s32 %s344_s9, %s382_s12  ;;  %p53_p0 = scmp.ne.s32.totalorder %s340_s8, %s336_s7 }
   0x7   : > { %p41_p1 = scmp.eq.s32.totalorder %s40_s14, 0  ;;  %p54_p2 = scmp.eq.s32.totalorder %s378_s10, 1 }
   0x8   : > { %p59_p3 = scmp.ne.s32.totalorder %s336_s7, %s332_s6  ;;  %p60_p4 = scmp.eq.s32.totalorder %s188_s11, 1 }
   0x9   : > { %s393_s15 = scalar_select %p41_p1, %s340_s8, %s43_s13  }
   0xa   : > { %p395_p5 = por %p54_p2, %p53_p0  ;;  %p399_p6 = por %p60_p4, %p59_p3 }
   0xb   : > { %p189_p7 = scmp.ge.s32.totalorder %s344_s9, 1  ;;  %p67_p8 = scmp.lt.s32.totalorder %s344_s9, 3 }
   0xc   : > { %p212_p9 = scmp.eq.s32.totalorder %s378_s10, 0  ;;  %s79_s20 = sshll.u32 %s441_s0, 4  ;;  %s80_s20 = int_to_ptr.hbm [resolvable:$true] %s79_s20 }
   0xd   : > { %p68_p10 = pnand %p189_p7, %p67_p8  ;;  %s346_s21 = smov [#allocation2]  }
   0xe   : > { %s81_s22 = sshll.u32 %s346_s21, 4  ;;  %s82_s22 = int_to_ptr.vmem [resolvable:$true] %s81_s22 }
   0xf   : > { %p204_p11 = pneg %p68_p10  ;;  %94 = sbr.rel (%p68_p10) target bundleno = 37 (0x25), region = 24 }
  0x11   : > { %p205_p12 = pnand %p212_p9, %p204_p11 }
  0x13   : > { %207 = dma.hbm_to_vmem [thread:$0]  (!%p205_p12), %s80_s20, 128, %s82_s22, [#allocation3]  }
  0x14   : > { %323 = dma.done.wait (%p212_p9), [#allocation3], 128  }
  0x15   : > { %325 = vsyncadd (%p212_p9), [#allocation3], 4294967168  ;;  %s107_s23 = sand.u32 1, %s336_s7   ;;  %s195_s24 = sshll.u32 %s378_s10, 3  ;;  %v110_v0 = vld [vmem:[#allocation2] sm:$0xff] }
  0x16   : > { %s193_s25 = sshll.u32 %s107_s23, 3  ;;  %s124_s28 = scalar_lea.hbm %s442_s1, %s195_s24  ;;  %v111_v1 = vadd.f32 1.0, %v110_v0 }
  0x17   : > { %s109_s29 = scalar_lea.vmem [#allocation5], %s193_s25  ;;  %s128_s2 = sshll.u32 %s124_s28, 4  ;;  %s129_s2 = int_to_ptr.hbm [resolvable:$true] %s128_s2 }
  0x18   : > { %s126_s30 = sshll.u32 %s109_s29, 4  ;;  %112 = vst [vmem:[%s109_s29] sm:$0xff] %v111_v1  ;;  %s114_s3 = scalar_lea.sflag [#allocation4], %s107_s23  ;;  %s127_s30 = int_to_ptr.vmem [resolvable:$true] %s126_s30 }
  0x19   : > { %s292_s4 = sshra.s32 %s129_s2, 4  ;;  %s298_s13 = scalar_lea.hbm %s442_s1, 16  ;;  %s293_s4 = int_to_ptr.hbm [resolvable:$true] %s292_s4 }
  0x1a   : > { %s294_s5 = scalar_lea.hbm %s293_s4, 8  ;;  %p299_p2 = scmp.lt.s32.totalorder %s293_s4, %s442_s1 }
  0x1b   : > { %p295_p13 = scmp.ne.s32.totalorder %s293_s4, %s294_s5  ;;  %p300_p3 = scmp.lt.s32.totalorder %s298_s13, %s294_s5 }
  0x1d   : > { %p296_p0 = pnand %p295_p13, %p395_p5  ;;  %p301_p4 = por %p300_p3, %p299_p2 }
  0x1f   : > { %p297_p1 = pneg %p296_p0 }
  0x21   : > { %p302_p7 = pnand %p301_p4, %p297_p1 }
  0x23   : > { %305 = shalt.err (!%p302_p7)
}
  0x24   : > { %202 = dma.vmem_to_hbm [thread:$0]  (%p395_p5), %s127_s30, 128, %s129_s2, %s114_s3  }
  0x25 PF: > { %p214_p8 = scmp.ge.s32.totalorder %s344_s9, 2  ;;  %s140_s19 = sand.u32 1, %s332_s6  }
  0x26   : > { %s141_s20 = scalar_lea.sflag [#allocation4], %s140_s19 }
  0x27   : > { %p209_p9 = pnand %p214_p8, %p399_p6 }
  0x29   : > { %p210_p10 = pneg %p209_p9 }
  0x2b   : > { %327 = dma.done.wait (%p210_p10), %s141_s20, 128  }
  0x2c   : > { %329 = vsyncadd (%p210_p10), %s141_s20, 4294967168  ;;  %p12_p11 = scmp.ge.s32.totalorder %s382_s12, 4   ;;  %s445_s6 = smov %s336_s7 }
  0x2d   : > { %s446_s7 = smov %s340_s8  ;;  %s447_s8 = smov %s393_s15 }
  0x2e   : > { %s448_s9 = smov %s382_s12  ;;  %14 = sbr.rel (!%p12_p11) target bundleno = 4 (0x4), region = 61 }
  0x33   :  { %147 = vsyncpa [#allocation3], 1 }
  0x34   :  { %149 = vsyncpa [#allocation3 + $0x1], 1 }
  0x35   :  { %150 = vsyncpa [#allocation4], 1 }
  0x36   :  { %152 = vsyncpa [#allocation4 + $0x1], 1 }

// kernel: _forward.1
= control target key start
LH: loop header
LB: loop body
LE: loop exit
PB: predicated region body
PF: predicated region fallthrough
CT: control target
= control target key end

     0   :  { %12 = vsyncpa [#allocation3], 0  ;;  %s622_s0 = inlined_call_operand.vmem [shape: bf16[10,128], index: 0, kind: input, shape index: {}]   ;;  %s623_s1 = inlined_call_operand.hbm [shape: bf16[128,128], index: 1, kind: input, shape index: {}]   ;;  %s624_s2 = inlined_call_operand.vmem [shape: f32[1,128], index: 2, kind: input, shape index: {}]   ;;  %s625_s3 = inlined_call_operand.hbm [shape: bf16[128,128], index: 3, kind: input, shape index: {}]   ;;  %s626_s4 = inlined_call_operand.vmem [shape: f32[1,128], index: 4, kind: input, shape index: {}]   ;;  %s627_s5 = inlined_call_operand.hbm [shape: bf16[128,128], index: 5, kind: input, shape index: {}]   ;;  %s628_s6 = inlined_call_operand.vmem [shape: f32[1,128], index: 6, kind: input, shape index: {}]   ;;  %s629_s7 = inlined_call_operand.vmem [shape: f32[10,128], index: 7, kind: output, shape index: {}]  }
   0x1   :  { %13 = vsyncpa [#allocation5], 0  ;;  %s35_s26 = sshll.u32 %s625_s3, 4  ;;  %s550_s27 = smov [#allocation4]   ;;  %s36_s26 = int_to_ptr.hbm [resolvable:$true] %s35_s26 }
   0x2   :  { %s37_s28 = sshll.u32 %s550_s27, 4  ;;  %s20_s8 = sshll.u32 %s623_s1, 4  ;;  %s38_s28 = int_to_ptr.vmem [resolvable:$true] %s37_s28  ;;  %s21_s8 = int_to_ptr.hbm [resolvable:$true] %s20_s8 }
   0x3   :  { %s551_s9 = smov 64   ;;  %s552_s10 = smov 4  }
   0x4   :  { %43 = dma.hbm_to_vmem [thread:$0]  %s36_s26, 1024, %s38_s28, [#allocation5], %s551_s9, %s551_s9, %s552_s10  }
   0x5   :  { %s553_s11 = smov [#allocation2]   ;;  %s50_s15 = sshll.u32 %s627_s5, 4  ;;  %s51_s15 = int_to_ptr.hbm [resolvable:$true] %s50_s15 }
   0x6   :  { %s22_s12 = sshll.u32 %s553_s11, 4  ;;  %s554_s3 = smov [#allocation6]   ;;  %s23_s12 = int_to_ptr.vmem [resolvable:$true] %s22_s12 }
   0x7   :  { %28 = dma.hbm_to_vmem [thread:$0]  %s21_s8, 1024, %s23_s12, [#allocation3], %s551_s9, %s551_s9, %s552_s10  }
   0x8   :  { %s52_s16 = sshll.u32 %s554_s3, 4  ;;  %s53_s16 = int_to_ptr.vmem [resolvable:$true] %s52_s16 }
   0x9   :  { %58 = dma.hbm_to_vmem [thread:$0]  %s51_s15, 1024, %s53_s16, [#allocation5], %s551_s9, %s551_s9, %s552_s10  }
   0xa   :  { %546 = dma.done.wait [#allocation3], 1024  }
   0xb   :  { %547 = vsyncadd [#allocation3], 4294966272 }
   0xc   :  { %548 = dma.done.wait [#allocation5], 2048  }
   0xd   :  { %549 = vsyncadd [#allocation5], 4294965248  ;;  %v449_v0 = vld [vmem:[#allocation2 + $0x38] sm:$0xff]  ;;  %v448_v1 = vld [vmem:[#allocation2 + $0x30] sm:$0xff] }
   0xe   :  { %149 = vmatpush.bf16.msra.mxu0 %v449_v0  ;;  %v457_v2 = vld [vmem:[#allocation4 + $0x38] sm:$0xff]  ;;  %v456_v3 = vld [vmem:[#allocation4 + $0x30] sm:$0xff]  ;;  %v447_v4 = vld [vmem:[#allocation2 + $0x28] sm:$0xff] }
   0xf   :  { %234 = vmatpush.bf16.msra.mxu1 %v457_v2  ;;  %v455_v5 = vld [vmem:[#allocation4 + $0x28] sm:$0xff]  ;;  %v446_v6 = vld [vmem:[#allocation2 + $0x20] sm:$0xff]  ;;  %v445_v8 = vld [vmem:[#allocation2 + $0x18] sm:$0xff] }
  0x10   :  { %v454_v7 = vld [vmem:[#allocation4 + $0x20] sm:$0xff]  ;;  %v444_v9 = vld [vmem:[#allocation2 + $0x10] sm:$0xff]  ;;  %v443_v10 = vld [vmem:[#allocation2 + $0x8] sm:$0xff] }
  0x11   :  { %v442_v11 = vld [vmem:[#allocation2] sm:$0xff]  ;;  %v453_v13 = vld [vmem:[#allocation4 + $0x18] sm:$0xff]  ;;  %v452_v14 = vld [vmem:[#allocation4 + $0x10] sm:$0xff] }
  0x12   :  { %150 = vmatpush.bf16.msra.mxu0 %v448_v1  ;;  %v441_v12 = vld [vmem:[%s622_s0] sm:$0xff]  ;;  %v451_v15 = vld [vmem:[#allocation4 + $0x8] sm:$0xff]  ;;  %v465_v17 = vld [vmem:[#allocation6 + $0x38] sm:$0xff] }
  0x13   :  { %235 = vmatpush.bf16.msra.mxu1 %v456_v3  ;;  %v450_v16 = vld [vmem:[#allocation4] sm:$0xff]  ;;  %319 = vmatpush.bf16.msra.mxu2 %v465_v17  ;;  %v464_v18 = vld [vmem:[#allocation6 + $0x30] sm:$0xff]  ;;  %v463_v19 = vld [vmem:[#allocation6 + $0x28] sm:$0xff] }
  0x14   :  { %v462_v20 = vld [vmem:[#allocation6 + $0x20] sm:$0xff]  ;;  %v461_v29 = vld [vmem:[#allocation6 + $0x18] sm:$0xff]  ;;  %v460_v30 = vld [vmem:[#allocation6 + $0x10] sm:$0xff] }
  0x15   :  { %v471_v22 = vld [vmem:[%s624_s2] ss:$0 sm:$0xff]  ;;  %v459_v31 = vld [vmem:[#allocation6 + $0x8] sm:$0xff] }
  0x16   :  { %151 = vmatpush.bf16.msra.mxu0 %v447_v4  ;;  %v458_v32 = vld [vmem:[#allocation6] sm:$0xff] }
  0x17   :  { %236 = vmatpush.bf16.msra.mxu1 %v455_v5  ;;  %320 = vmatpush.bf16.msra.mxu2 %v464_v18  ;;  %v472_v34 = vld [vmem:[%s626_s4] ss:$0 sm:$0xff] }
  0x18   :  { %v473_v41 = vld [vmem:[%s628_s6] ss:$0 sm:$0xff] }
  0x1a   :  { %152 = vmatpush.bf16.msra.mxu0 %v446_v6 }
  0x1b   :  { %237 = vmatpush.bf16.msra.mxu1 %v454_v7  ;;  %321 = vmatpush.bf16.msra.mxu2 %v463_v19 }
  0x1e   :  { %153 = vmatpush.bf16.msra.mxu0 %v445_v8 }
  0x1f   :  { %238 = vmatpush.bf16.msra.mxu1 %v453_v13  ;;  %322 = vmatpush.bf16.msra.mxu2 %v462_v20 }
  0x22   :  { %154 = vmatpush.bf16.msra.mxu0 %v444_v9 }
  0x23   :  { %239 = vmatpush.bf16.msra.mxu1 %v452_v14  ;;  %323 = vmatpush.bf16.msra.mxu2 %v461_v29 }
  0x26   :  { %155 = vmatpush.bf16.msra.mxu0 %v443_v10 }
  0x27   :  { %240 = vmatpush.bf16.msra.mxu1 %v451_v15  ;;  %324 = vmatpush.bf16.msra.mxu2 %v460_v30 }
  0x2a   :  { %156 = vmatpush.bf16.msra.mxu0 %v442_v11 }
  0x2b   :  { %241 = vmatpush.bf16.msra.mxu1 %v450_v16  ;;  %325 = vmatpush.bf16.msra.mxu2 %v459_v31 }
  0x2d   :  { %157 = vmatmul.bf16.vlgmr.msra.gmra.mxu0 %v441_v12 }
  0x2f   :  { %326 = vmatpush.bf16.msra.mxu2 %v458_v32 }
  0xaa   :  { %v158_v21 = vpop.f32.mrf.mxu0 }
  0xab   :  { %v159_v23 = vadd.f32 %v471_v22, %v158_v21 }
  0xad   :  { %v163_v26 = vmax.f32 %v159_v23, 0.0 }
  0xb2   :  { %v160_v24 = vpop.f32.mrf.mxu0 }
  0xb3   :  { %v161_v25 = vadd.f32 %v471_v22, %v160_v24 }
  0xb5   :  { %v164_v27 = vmax.f32 %v161_v25, 0.0 }
  0xb7   :  { %v165_v28 = vpack.c.bf16 %v164_v27, %v163_v26 }
  0xb9   :  { %242 = vmatmul.bf16.vlgmr.msra.gmra.mxu1 %v165_v28 }
 0x136   :  { %v243_v33 = vpop.f32.mrf.mxu1 }
 0x137   :  { %v244_v35 = vadd.f32 %v472_v34, %v243_v33 }
 0x139   :  { %v248_v38 = vmax.f32 %v244_v35, 0.0 }
 0x13e   :  { %v245_v36 = vpop.f32.mrf.mxu1 }
 0x13f   :  { %v246_v37 = vadd.f32 %v472_v34, %v245_v36 }
 0x141   :  { %v249_v39 = vmax.f32 %v246_v37, 0.0 }
 0x143   :  { %v250_v40 = vpack.c.bf16 %v249_v39, %v248_v38 }
 0x145   :  { %327 = vmatmul.bf16.vlgmr.msra.gmra.mxu2 %v250_v40 }
 0x1c8   :  { %v328_v42 = vpop.f32.mrf.mxu2 }
 0x1c9   :  { %v329_v43 = vadd.f32 %v473_v41, %v328_v42 }
 0x1cb   :  { %333 = vst [vmem:[%s629_s7] sm:$0xff] %v329_v43 }
 0x1d0   :  { %v330_v44 = vpop.f32.mrf.mxu2 }
 0x1d1   :  { %v331_v45 = vadd.f32 %v473_v41, %v330_v44 }
 0x1d3   :  { %334 = vst [vmem:[%s629_s7 + $0x8] sm:$0xff] %v331_v45 }
 0x1d4   :  { %339 = vsyncpa [#allocation3], 1 }
 0x1d5   :  { %340 = vsyncpa [#allocation5], 1 }

</bundles_post_ra>
